<compile_context>
chip_gen: v5e
topology: v5e:2x2
jax: 0.10.0
libtpu: 0.0.40
codegen_flags: <defaults>
</compile_context>

<pallas_src>
import jax
import jax.numpy as jnp
from jax.experimental import pallas as pl
from jax.experimental.pallas import tpu as pltpu


def _round_up(x, m):
    return (x + m - 1) // m * m


def _mm_gated_attention_kernel(a_ref, v_ref, l_ref, w_ref, b_ref, out_ref):
    f32 = jnp.float32
    a = a_ref[...]
    v = v_ref[...]
    l = l_ref[...]

    # Fused LHS X = [a | v | l | a*v | a*l | v*l]  -> [TM, 6D]; cast once to bf16.
    x = jnp.concatenate([a, v, l, a * v, a * l, v * l], axis=-1)
    x16 = x.astype(jnp.bfloat16)

    # Single MXU matmul against the host-prearranged [6D, 3*GW] bf16 weight,
    # f32 accumulation; bias row added in f32.
    y = jnp.dot(x16, w_ref[...], preferred_element_type=f32) + b_ref[...]

    gw = out_ref.shape[-1]                      # 128-aligned -> lane-aligned slices
    h1 = jnp.tanh(y[:, :gw])                    # [ha | ha | hv]
    h2 = jnp.tanh(y[:, gw:2 * gw])              # [hv | hl | hl]
    z = jax.nn.sigmoid(y[:, 2 * gw:])           # gates, column-replicated per chunk

    # z*h1 + (1-z)*h2, written as one fused blend (one fewer VPU multiply).
    out_ref[...] = (h2 + z * (h1 - h2)).astype(out_ref.dtype)


def _prepare_fused_params(p):
    """Arrange module parameters into one fused [6D, 3*GW] bf16 weight + f32 bias row."""
    wa, ba = p["wa"], p["ba"]
    wv, bv = p["wv"], p["bv"]
    wl, bl = p["wl"], p["bl"]
    gav, gal, gvl, gb = p["gav"], p["gal"], p["gvl"], p["gb"]

    D, C = wa.shape
    out = 3 * C
    gw = max(_round_up(out, 128), 128)          # lane-dense group width
    pad_c = gw - out

    z = jnp.zeros((D, C), jnp.float32)
    z3 = jnp.zeros((D, out), jnp.float32)

    def rep(w):                                  # (D,) gate vector -> (D, C) replicated cols
        return jnp.tile(w.reshape(D, 1).astype(jnp.float32), (1, C))

    def group(blocks):                           # 6 row-blocks of (D, 3C) -> (6D, GW)
        return jnp.pad(jnp.concatenate(blocks, axis=0), ((0, 0), (0, pad_c)))

    # Row-block order matches X = [a, v, l, a*v, a*l, v*l].
    w_p1 = group([jnp.concatenate([wa, wa, z], axis=1),        # a
                  jnp.concatenate([z, z, wv], axis=1),         # v
                  z3, z3, z3, z3])
    w_p2 = group([z3,
                  jnp.concatenate([wv, z, z], axis=1),         # v
                  jnp.concatenate([z, wl, wl], axis=1),        # l
                  z3, z3, z3])
    w_s = group([jnp.concatenate([rep(gav[0]), rep(gal[0]), z], axis=1),   # a
                 jnp.concatenate([rep(gav[1]), z, rep(gvl[0])], axis=1),   # v
                 jnp.concatenate([z, rep(gal[1]), rep(gvl[1])], axis=1),   # l
                 jnp.concatenate([rep(gav[2]), z, z], axis=1),             # a*v
                 jnp.concatenate([z, rep(gal[2]), z], axis=1),             # a*l
                 jnp.concatenate([z, z, rep(gvl[2])], axis=1)])            # v*l
    w_full = jnp.concatenate([w_p1, w_p2, w_s], axis=1).astype(jnp.bfloat16)

    ones = jnp.ones((1, C), jnp.float32)

    def padb(b):                                 # (1, 3C) -> (1, GW)
        return jnp.pad(b.astype(jnp.float32), ((0, 0), (0, pad_c)))

    b_full = jnp.concatenate([
        padb(jnp.concatenate([ba, ba, bv], axis=1)),
        padb(jnp.concatenate([bv, bl, bl], axis=1)),
        padb(jnp.concatenate([gb[0, 0] * ones, gb[0, 1] * ones, gb[0, 2] * ones], axis=1)),
    ], axis=1)                                   # (1, 3*GW) f32
    return w_full, b_full, gw


def mm_gated_attention(a, v, l, params, *, tm=1024):
    """a, v, l: [N, mem_dim] float32.  Returns [N, 3*cand_dim] float32."""
    N, D = a.shape
    C = params["wa"].shape[1]
    out_dim = 3 * C

    w_full, b_full, gw = _prepare_fused_params(params)

    TM = min(tm, _round_up(N, 8))                # sublane-aligned row tile
    grid = (pl.cdiv(N, TM),)                     # ragged last block handled by Pallas

    x_spec = pl.BlockSpec((TM, D), lambda i: (i, 0))           # streamed per tile
    w_spec = pl.BlockSpec(w_full.shape, lambda i: (0, 0))      # VMEM-resident
    b_spec = pl.BlockSpec(b_full.shape, lambda i: (0, 0))      # VMEM-resident
    out_spec = pl.BlockSpec((TM, gw), lambda i: (i, 0))

    cost = pl.CostEstimate(
        flops=int(2 * N * (6 * D) * (3 * gw) + 12 * N * gw),
        transcendentals=int(3 * N * gw),
        bytes_accessed=int(4 * 3 * N * D + 4 * N * gw
                           + 2 * w_full.size + 4 * b_full.size),
    )

    out = pl.pallas_call(
        _mm_gated_attention_kernel,
        out_shape=jax.ShapeDtypeStruct((N, gw), jnp.float32),
        grid=grid,
        in_specs=[x_spec, x_spec, x_spec, w_spec, b_spec],
        out_specs=out_spec,
        compiler_params=pltpu.CompilerParams(
            dimension_semantics=("parallel",),
            vmem_limit_bytes=32 * 1024 * 1024),
        cost_estimate=cost,
    )(a, v, l, w_full, b_full)

    if gw != out_dim:                            # only when 3*cand_dim not 128-aligned
        out = out[:, :out_dim]
    return out


def init_params(key, mem_dim, cand_dim):
    ks = jax.random.split(key, 12)
    sc = 1.0 / jnp.sqrt(mem_dim)
    sc3 = 1.0 / jnp.sqrt(3 * mem_dim)
    return {
        # transform_{a,v,l}: Linear(mem_dim -> cand_dim), stored transposed [in, out]
        "wa": jax.random.uniform(ks[0], (mem_dim, cand_dim), jnp.float32, -sc, sc),
        "ba": jax.random.uniform(ks[1], (1, cand_dim), jnp.float32, -sc, sc),
        "wv": jax.random.uniform(ks[2], (mem_dim, cand_dim), jnp.float32, -sc, sc),
        "bv": jax.random.uniform(ks[3], (1, cand_dim), jnp.float32, -sc, sc),
        "wl": jax.random.uniform(ks[4], (mem_dim, cand_dim), jnp.float32, -sc, sc),
        "bl": jax.random.uniform(ks[5], (1, cand_dim), jnp.float32, -sc, sc),
        # transform_{av,al,vl}: Linear(3*mem_dim -> 1) as (3, mem_dim): rows = [x, y, x*y]
        "gav": jax.random.uniform(ks[6], (3, mem_dim), jnp.float32, -sc3, sc3),
        "gal": jax.random.uniform(ks[7], (3, mem_dim), jnp.float32, -sc3, sc3),
        "gvl": jax.random.uniform(ks[8], (3, mem_dim), jnp.float32, -sc3, sc3),
        "gb":  jax.random.uniform(ks[9], (1, 3), jnp.float32, -sc3, sc3),
    }


def reference_jax(a, v, l, p):
    hi = jax.lax.Precision.HIGHEST
    ha = jnp.tanh(jnp.dot(a, p["wa"], precision=hi) + p["ba"])
    hv = jnp.tanh(jnp.dot(v, p["wv"], precision=hi) + p["bv"])
    hl = jnp.tanh(jnp.dot(l, p["wl"], precision=hi) + p["bl"])

    def gate(x, y, g, b):
        cat = jnp.concatenate([x, y, x * y], axis=-1)
        w = jnp.concatenate([g[0], g[1], g[2]], axis=-1)[:, None]
        return jax.nn.sigmoid(jnp.dot(cat, w, precision=hi) + b)

    z_av = gate(a, v, p["gav"], p["gb"][0, 0])
    z_al = gate(a, l, p["gal"], p["gb"][0, 1])
    z_vl = gate(v, l, p["gvl"], p["gb"][0, 2])
    h_av = z_av * ha + (1 - z_av) * hv
    h_al = z_al * ha + (1 - z_al) * hl
    h_vl = z_vl * hv + (1 - z_vl) * hl
    return jnp.concatenate([h_av, h_al, h_vl], axis=-1)


if __name__ == "__main__":
    # Config 1: 3*cand_dim is 128-aligned (no column trim, fully lane-dense output).
    mem_dim, cand_dim = 32, 128
    ka, kv, kl, kp = jax.random.split(jax.random.PRNGKey(0), 4)
    params = init_params(kp, mem_dim, cand_dim)

    N = 8
    a = jax.random.normal(ka, (N, mem_dim), jnp.float32)
    v = jax.random.normal(kv, (N, mem_dim), jnp.float32)
    l = jax.random.normal(kl, (N, mem_dim), jnp.float32)
    out = jax.block_until_ready(mm_gated_attention(a, v, l, params))
    ref = reference_jax(a, v, l, params)
    assert out.shape == (N, 3 * cand_dim)
    assert jnp.allclose(out, ref, rtol=0, atol=3e-2), "mismatch vs reference (small)"

    # Config 2: multi-step grid with ragged last row block (no pad / no trim copies).
    N2 = 300
    ka2, kv2, kl2 = jax.random.split(jax.random.PRNGKey(1), 3)
    a2 = jax.random.normal(ka2, (N2, mem_dim), jnp.float32)
    v2 = jax.random.normal(kv2, (N2, mem_dim), jnp.float32)
    l2 = jax.random.normal(kl2, (N2, mem_dim), jnp.float32)
    out2 = jax.block_until_ready(mm_gated_attention(a2, v2, l2, params, tm=128))
    ref2 = reference_jax(a2, v2, l2, params)
    assert out2.shape == (N2, 3 * cand_dim)
    assert jnp.allclose(out2, ref2, rtol=0, atol=3e-2), "mismatch vs reference (ragged)"

    # Config 3: 3*cand_dim not 128-aligned -> exercises padded width + column trim.
    mem_dim3, cand_dim3 = 32, 32
    params3 = init_params(jax.random.PRNGKey(2), mem_dim3, cand_dim3)
    N3 = 40
    k3 = jax.random.split(jax.random.PRNGKey(3), 3)
    a3 = jax.random.normal(k3[0], (N3, mem_dim3), jnp.float32)
    v3 = jax.random.normal(k3[1], (N3, mem_dim3), jnp.float32)
    l3 = jax.random.normal(k3[2], (N3, mem_dim3), jnp.float32)
    out3 = jax.block_until_ready(mm_gated_attention(a3, v3, l3, params3))
    ref3 = reference_jax(a3, v3, l3, params3)
    assert out3.shape == (N3, 3 * cand_dim3)
    assert jnp.allclose(out3, ref3, rtol=0, atol=3e-2), "mismatch vs reference (trim)"

    print("KERNEL_OK")
</pallas_src>

<mosaic_0001>
module attributes {stable_mosaic.version = 11 : i64} {
  func.func @_mm_gated_attention_kernel(%arg0: i32, %arg1: memref<8x32xf32, #tpu.memory_space<vmem>>, %arg2: memref<8x32xf32, #tpu.memory_space<vmem>>, %arg3: memref<8x32xf32, #tpu.memory_space<vmem>>, %arg4: memref<192x1152xbf16, #tpu.memory_space<vmem>>, %arg5: memref<1x1152xf32, #tpu.memory_space<vmem>>, %arg6: memref<8x384xf32, #tpu.memory_space<vmem>>) attributes {dimension_semantics = [#tpu.dimension_semantics<parallel>], iteration_bounds = array<i64: 1>, scalar_prefetch = 0 : i64, scratch_operands = 0 : i64, tpu.core_type = #tpu.core_type<tc>, window_params = [{transform_indices = @transform_0, window_bounds = array<i64: 8, 32>}, {transform_indices = @transform_1, window_bounds = array<i64: 8, 32>}, {transform_indices = @transform_2, window_bounds = array<i64: 8, 32>}, {pipeline_mode = #tpu.pipeline_mode<synchronous>, transform_indices = @transform_3, window_bounds = array<i64: 192, 1152>}, {pipeline_mode = #tpu.pipeline_mode<synchronous>, transform_indices = @transform_4, window_bounds = array<i64: 1, 1152>}, {transform_indices = @transform_5, window_bounds = array<i64: 8, 384>}]} {
    %c0 = arith.constant 0 : index
    %c0_0 = arith.constant 0 : index
    %0 = vector.load %arg1[%c0, %c0_0] : memref<8x32xf32, #tpu.memory_space<vmem>>, vector<8x32xf32>
    %c0_1 = arith.constant 0 : index
    %c0_2 = arith.constant 0 : index
    %1 = vector.load %arg2[%c0_1, %c0_2] : memref<8x32xf32, #tpu.memory_space<vmem>>, vector<8x32xf32>
    %c0_3 = arith.constant 0 : index
    %c0_4 = arith.constant 0 : index
    %2 = vector.load %arg3[%c0_3, %c0_4] : memref<8x32xf32, #tpu.memory_space<vmem>>, vector<8x32xf32>
    %3 = arith.mulf %0, %1 : vector<8x32xf32>
    %4 = arith.mulf %0, %2 : vector<8x32xf32>
    %5 = arith.mulf %1, %2 : vector<8x32xf32>
    %6 = tpu.concatenate %0, %1, %2, %3, %4, %5 in 1 : vector<8x32xf32>, vector<8x32xf32>, vector<8x32xf32>, vector<8x32xf32>, vector<8x32xf32>, vector<8x32xf32> -> vector<8x192xf32>
    %7 = arith.truncf %6 : vector<8x192xf32> to vector<8x192xbf16>
    %c0_5 = arith.constant 0 : index
    %c0_6 = arith.constant 0 : index
    %8 = vector.load %arg4[%c0_5, %c0_6] : memref<192x1152xbf16, #tpu.memory_space<vmem>>, vector<192x1152xbf16>
    %cst = arith.constant dense<0.000000e+00> : vector<8x1152xf32>
    %9 = tpu.matmul %7, %8, %cst {dimension_numbers = #tpu.dot_dimension_numbers<[1], [0], [0], [1], [0, 0, 1, 1], [], []>} : vector<8x192xbf16>, vector<192x1152xbf16>, vector<8x1152xf32> -> vector<8x1152xf32>
    %c0_7 = arith.constant 0 : index
    %c0_8 = arith.constant 0 : index
    %10 = vector.load %arg5[%c0_7, %c0_8] : memref<1x1152xf32, #tpu.memory_space<vmem>>, vector<1x1152xf32>
    %11 = vector.broadcast %10 : vector<1x1152xf32> to vector<8x1152xf32>
    %12 = arith.addf %9, %11 : vector<8x1152xf32>
    %13 = vector.extract_strided_slice %12 {offsets = [0, 0], sizes = [8, 384], strides = [1, 1]} : vector<8x1152xf32> to vector<8x384xf32>
    %14 = math.tanh %13 : vector<8x384xf32>
    %15 = vector.extract_strided_slice %12 {offsets = [0, 384], sizes = [8, 384], strides = [1, 1]} : vector<8x1152xf32> to vector<8x384xf32>
    %16 = math.tanh %15 : vector<8x384xf32>
    %17 = vector.extract_strided_slice %12 {offsets = [0, 768], sizes = [8, 384], strides = [1, 1]} : vector<8x1152xf32> to vector<8x384xf32>
    %18 = arith.negf %17 : vector<8x384xf32>
    %19 = math.exp %18 : vector<8x384xf32>
    %cst_9 = arith.constant 1.000000e+00 : f32
    %20 = vector.broadcast %cst_9 : f32 to vector<8x384xf32>
    %21 = arith.addf %20, %19 : vector<8x384xf32>
    %22 = arith.divf %20, %21 : vector<8x384xf32>
    %23 = arith.subf %14, %16 : vector<8x384xf32>
    %24 = arith.mulf %22, %23 : vector<8x384xf32>
    %25 = arith.addf %16, %24 : vector<8x384xf32>
    %c0_10 = arith.constant 0 : index
    %c0_11 = arith.constant 0 : index
    %26 = vector.load %arg6[%c0_10, %c0_11] : memref<8x384xf32, #tpu.memory_space<vmem>>, vector<8x384xf32>
    tpu.vector_store %arg6[%c0_10, %c0_11], %25 {strides = array<i32>} : memref<8x384xf32, #tpu.memory_space<vmem>>, vector<8x384xf32>,
    return
  }
  func.func @transform_0(%arg0: i32) -> (i32, i32) {
    %c0_i32 = arith.constant 0 : i32
    %c0_i32_0 = arith.constant 0 : i32
    return %arg0, %c0_i32 : i32, i32
  }
  func.func @transform_1(%arg0: i32) -> (i32, i32) {
    %c0_i32 = arith.constant 0 : i32
    %c0_i32_0 = arith.constant 0 : i32
    return %arg0, %c0_i32 : i32, i32
  }
  func.func @transform_2(%arg0: i32) -> (i32, i32) {
    %c0_i32 = arith.constant 0 : i32
    %c0_i32_0 = arith.constant 0 : i32
    return %arg0, %c0_i32 : i32, i32
  }
  func.func @transform_3(%arg0: i32) -> (i32, i32) {
    %c0_i32 = arith.constant 0 : i32
    %c0_i32_0 = arith.constant 0 : i32
    %c0_i32_1 = arith.constant 0 : i32
    return %c0_i32, %c0_i32_0 : i32, i32
  }
  func.func @transform_4(%arg0: i32) -> (i32, i32) {
    %c0_i32 = arith.constant 0 : i32
    %c0_i32_0 = arith.constant 0 : i32
    %c0_i32_1 = arith.constant 0 : i32
    return %c0_i32, %c0_i32_0 : i32, i32
  }
  func.func @transform_5(%arg0: i32) -> (i32, i32) {
    %c0_i32 = arith.constant 0 : i32
    %c0_i32_0 = arith.constant 0 : i32
    return %arg0, %c0_i32 : i32, i32
  }
}

</mosaic_0001>

<bundles_post_ra>
// kernel: tpu_custom_call.1
= control target key start
LH: loop header
LB: loop body
LE: loop exit
PB: predicated region body
PF: predicated region fallthrough
CT: control target
= control target key end

     0   :  { %10 = vsyncpa [#allocation3], 0  ;;  %s2016_s0 = inlined_call_operand.hbm [shape: f32[8,32], index: 0, kind: input, shape index: {}]   ;;  %s2017_s1 = inlined_call_operand.hbm [shape: f32[8,32], index: 1, kind: input, shape index: {}]   ;;  %s2018_s2 = inlined_call_operand.hbm [shape: f32[8,32], index: 2, kind: input, shape index: {}]   ;;  %s2019_s3 = inlined_call_operand.hbm [shape: bf16[192,1152], index: 3, kind: input, shape index: {}]   ;;  %s2020_s4 = inlined_call_operand.hbm [shape: f32[1,1152], index: 4, kind: input, shape index: {}]   ;;  %s2021_s5 = inlined_call_operand.hbm [shape: f32[8,384], index: 5, kind: output, shape index: {}]  }
   0x1   :  { %11 = vsyncpa [#allocation6], 0 }
   0x2   :  { %12 = vsyncpa [#allocation9], 0  ;;  %s30_s20 = sshll.u32 %s2017_s1, 4  ;;  %s31_s20 = int_to_ptr.hbm [resolvable:$true] %s30_s20 }
   0x3   :  { %13 = vsyncpa [#allocation4], 0  ;;  %s1888_s21 = smov [#allocation5]   ;;  %s51_s25 = sshll.u32 %s2019_s3, 4  ;;  %s52_s25 = int_to_ptr.hbm [resolvable:$true] %s51_s25 }
   0x4   :  { %s32_s22 = sshll.u32 %s1888_s21, 4  ;;  %s1889_s26 = smov [#allocation8]   ;;  %s33_s22 = int_to_ptr.vmem [resolvable:$true] %s32_s22 }
   0x5   :  { %35 = dma.hbm_to_vmem [thread:$0]  %s31_s20, 128, %s33_s22, [#allocation6]  }
   0x6   :  { %s53_s27 = sshll.u32 %s1889_s26, 4  ;;  %s1890_s28 = smov 576   ;;  %s54_s27 = int_to_ptr.vmem [resolvable:$true] %s53_s27 }
   0x7   :  { %s1891_s29 = smov 36   ;;  %s19_s1 = sshll.u32 %s2016_s0, 4  ;;  %s20_s1 = int_to_ptr.hbm [resolvable:$true] %s19_s1 }
   0x8   :  { %59 = dma.hbm_to_vmem [thread:$0]  %s52_s25, 13824, %s54_s27, [#allocation9], %s1890_s28, %s1890_s28, %s1891_s29  }
   0x9   :  { %s1892_s7 = smov [#allocation2]   ;;  %s41_s3 = sshll.u32 %s2018_s2, 4  ;;  %s42_s3 = int_to_ptr.hbm [resolvable:$true] %s41_s3 }
   0xa   :  { %s21_s8 = sshll.u32 %s1892_s7, 4  ;;  %s1893_s11 = smov [#allocation7]   ;;  %s22_s8 = int_to_ptr.vmem [resolvable:$true] %s21_s8 }
   0xb   :  { %24 = dma.hbm_to_vmem [thread:$0]  %s20_s1, 128, %s22_s8, [#allocation3]  }
   0xc   :  { %s43_s12 = sshll.u32 %s1893_s11, 4  ;;  %s65_s15 = sshll.u32 %s2020_s4, 4  ;;  %s44_s12 = int_to_ptr.vmem [resolvable:$true] %s43_s12  ;;  %s66_s15 = int_to_ptr.hbm [resolvable:$true] %s65_s15 }
   0xd   :  { %46 = dma.hbm_to_vmem [thread:$0]  %s42_s3, 128, %s44_s12, [#allocation6]  }
   0xe   :  { %s1894_s0 = smov [#allocation10]  }
   0xf   :  { %s67_s16 = sshll.u32 %s1894_s0, 4  ;;  %s68_s16 = int_to_ptr.vmem [resolvable:$true] %s67_s16 }
  0x10   :  { %70 = dma.hbm_to_vmem [thread:$0]  %s66_s15, 144, %s68_s16, [#allocation9]  }
  0x11   :  { %1880 = dma.done.wait [#allocation3], 128  }
  0x12   :  { %1881 = vsyncadd [#allocation3], 4294967168 }
  0x13   :  { %1882 = dma.done.wait [#allocation6], 256  }
  0x14   :  { %1883 = vsyncadd [#allocation6], 4294967040 }
  0x15   :  { %1884 = dma.done.wait [#allocation9], 13968  }
  0x16   :  { %1885 = vsyncadd [#allocation9], 4294953328  ;;  %v93_v0 = vld [vmem:[#allocation5] sm:$0xff]  ;;  %v1944_v1 = vld [vmem:[#allocation7] sm:$0xff]  ;;  %s1895_s2 = smov 64   ;;  %s1896_s4 = smov 32  }
  0x17   :  { %v1946_v2 = vld [vmem:[#allocation2] sm:$0xff]  ;;  %v97_v3 = vmul.f32 %v1944_v1, %v93_v0  ;;  %103 = vrot.lane.b32.xlu1 %v1944_v1, %s1895_s2  ;;  %v1402_v4 = vld [vmem:[#allocation8 + $0x1f8] sm:$0xf]  ;;  %v1659_v5 = vld [vmem:[#allocation8 + $0x218] sm:$0xf0]  ;;  %s1897_s17 = smov 96  }
  0x18   :  { %v1366_v6 = vld [vmem:[#allocation8 + $0x1b0] sm:$0xf]  ;;  %v1403_v7 = vor.u32 %v1659_v5, %v1402_v4  ;;  %v1650_v8 = vld [vmem:[#allocation8 + $0x1d0] sm:$0xf0]  ;;  %v1546_v9 = vld [vmem:[#allocation8 + $0x318] sm:$0xf]  ;;  %v95_v16 = vmul.f32 %v93_v0, %v1946_v2 }
  0x19   :  { %v1695_v10 = vld [vmem:[#allocation8 + $0x338] sm:$0xf0]  ;;  %111 = vrot.lane.b32.xlu0 %v97_v3, %s1896_s4  ;;  %v1510_v12 = vld [vmem:[#allocation8 + $0x2d0] sm:$0xf]  ;;  %v1367_v13 = vor.u32 %v1650_v8, %v1366_v6  ;;  %v1330_v14 = vld [vmem:[#allocation8 + $0x168] sm:$0xf] }
  0x1a   :  { %v1547_v11 = vor.u32 %v1695_v10, %v1546_v9  ;;  %820 = vmatpush.bf16.msra.mxu0 %v1403_v7  ;;  %v1686_v15 = vld [vmem:[#allocation8 + $0x2f0] sm:$0xf0]  ;;  %v1641_v17 = vld [vmem:[#allocation8 + $0x188] sm:$0xf0]  ;;  %v1655_v19 = vld [vmem:[#allocation8 + $0x1fc] sm:$0xf] }
  0x1b   :  { %v1511_v18 = vor.u32 %v1686_v15, %v1510_v12  ;;  %v1404_v20 = vld [vmem:[#allocation8 + $0x21c] sm:$0xf0]  ;;  %v1474_v22 = vld [vmem:[#allocation8 + $0x288] sm:$0xf]  ;;  %v1677_v23 = vld [vmem:[#allocation8 + $0x2a8] sm:$0xf0]  ;;  %v1331_v26 = vor.u32 %v1641_v17, %v1330_v14 }
  0x1c   :  { %837 = vmatpush.bf16.msra.mxu1 %v1547_v11  ;;  %v1407_v21 = vor.u32 %v1655_v19, %v1404_v20  ;;  %v1646_v24 = vld [vmem:[#allocation8 + $0x1b4] sm:$0xf]  ;;  %v1368_v25 = vld [vmem:[#allocation8 + $0x1d4] sm:$0xf0]  ;;  %v1294_v27 = vld [vmem:[#allocation8 + $0x120] sm:$0xf]  ;;  %v1475_v32 = vor.u32 %v1677_v23, %v1474_v22 }
  0x1d   :  { %v1371_v28 = vor.u32 %v1646_v24, %v1368_v25  ;;  %v1691_v29 = vld [vmem:[#allocation8 + $0x31c] sm:$0xf]  ;;  %v1548_v30 = vld [vmem:[#allocation8 + $0x33c] sm:$0xf0]  ;;  %v1632_v31 = vld [vmem:[#allocation8 + $0x140] sm:$0xf0] }
  0x1e   :  { %821 = vmatpush.bf16.msra.mxu0 %v1367_v13  ;;  %846 = vmatpush.bf16.msra.mxu2 %v1407_v21  ;;  %v1438_v33 = vld [vmem:[#allocation8 + $0x240] sm:$0xf]  ;;  %v1668_v34 = vld [vmem:[#allocation8 + $0x260] sm:$0xf0]  ;;  %v1551_v35 = vor.u32 %v1691_v29, %v1548_v30  ;;  %v1637_v37 = vld [vmem:[#allocation8 + $0x16c] sm:$0xf]  ;;  %v1295_v42 = vor.u32 %v1632_v31, %v1294_v27 }
  0x1f   :  { %107 = vrot.lane.b32.xlu1 %v95_v16, %s1897_s17  ;;  %v1410_v36 = vld [vmem:[#allocation8 + $0x200] sm:$0xf]  ;;  %v1332_v38 = vld [vmem:[#allocation8 + $0x18c] sm:$0xf0]  ;;  %v1660_v39 = vld [vmem:[#allocation8 + $0x220] sm:$0xf0]  ;;  %v1439_v47 = vor.u32 %v1668_v34, %v1438_v33 }
  0x20   :  { %838 = vmatpush.bf16.msra.mxu1 %v1511_v18  ;;  %863 = vmatpush.bf16.msra.mxu3 %v1551_v35  ;;  %v1682_v40 = vld [vmem:[#allocation8 + $0x2d4] sm:$0xf]  ;;  %v1512_v41 = vld [vmem:[#allocation8 + $0x2f4] sm:$0xf0]  ;;  %v1623_v44 = vld [vmem:[#allocation8 + $0xf8] sm:$0xf0]  ;;  %v1335_v45 = vor.u32 %v1637_v37, %v1332_v38  ;;  %v1411_v51 = vor.u32 %v1660_v39, %v1410_v36 }
  0x21   :  { %99 = vrot.lane.b32.xlu0 %v93_v0, %s1896_s4  ;;  %v1258_v43 = vld [vmem:[#allocation8 + $0xd8] sm:$0xf]  ;;  %v1515_v46 = vor.u32 %v1682_v40, %v1512_v41  ;;  %v1628_v48 = vld [vmem:[#allocation8 + $0x124] sm:$0xf]  ;;  %v1296_v49 = vld [vmem:[#allocation8 + $0x144] sm:$0xf0] }
  0x22   :  { %822 = vmatpush.bf16.msra.mxu0 %v1331_v26  ;;  %847 = vmatpush.bf16.msra.mxu2 %v1371_v28  ;;  %v1673_v50 = vld [vmem:[#allocation8 + $0x28c] sm:$0xf]  ;;  %v1476_v52 = vld [vmem:[#allocation8 + $0x2ac] sm:$0xf0]  ;;  %v1374_v53 = vld [vmem:[#allocation8 + $0x1b8] sm:$0xf]  ;;  %v1259_v56 = vor.u32 %v1623_v44, %v1258_v43  ;;  %v1299_v59 = vor.u32 %v1628_v48, %v1296_v49 }
  0x23   :  { %v1651_v54 = vld [vmem:[#allocation8 + $0x1d8] sm:$0xf0]  ;;  %v1479_v55 = vor.u32 %v1673_v50, %v1476_v52  ;;  %v1222_v57 = vld [vmem:[#allocation8 + $0x90] sm:$0xf]  ;;  %v1614_v58 = vld [vmem:[#allocation8 + $0xb0] sm:$0xf0] }
  0x24   :  { %839 = vmatpush.bf16.msra.mxu1 %v1475_v32  ;;  %864 = vmatpush.bf16.msra.mxu3 %v1515_v46  ;;  %v1619_v60 = vld [vmem:[#allocation8 + $0xdc] sm:$0xf]  ;;  %v1260_v61 = vld [vmem:[#allocation8 + $0xfc] sm:$0xf0]  ;;  %v1664_v62 = vld [vmem:[#allocation8 + $0x244] sm:$0xf]  ;;  %v1375_v0 = vor.u32 %v1651_v54, %v1374_v53  ;;  %v1223_v8 = vor.u32 %v1614_v58, %v1222_v57 }
  0x25   :  { %v1440_v63 = vld [vmem:[#allocation8 + $0x264] sm:$0xf0]  ;;  %v1554_v3 = vld [vmem:[#allocation8 + $0x320] sm:$0xf]  ;;  %v1696_v4 = vld [vmem:[#allocation8 + $0x340] sm:$0xf0]  ;;  %v1263_v10 = vor.u32 %v1619_v60, %v1260_v61 }
  0x26   :  { %823 = vmatpush.bf16.msra.mxu0 %v1295_v42  ;;  %848 = vmatpush.bf16.msra.mxu2 %v1335_v45  ;;  %v1338_v5 = vld [vmem:[#allocation8 + $0x170] sm:$0xf]  ;;  %v1642_v6 = vld [vmem:[#allocation8 + $0x190] sm:$0xf0]  ;;  %v1443_v7 = vor.u32 %v1664_v62, %v1440_v63  ;;  %v1186_v9 = vld [vmem:[#allocation8 + $0x48] sm:$0xf]  ;;  %v1555_v12 = vor.u32 %v1696_v4, %v1554_v3 }
  0x27   :  { %v1605_v11 = vld [vmem:[#allocation8 + $0x68] sm:$0xf0]  ;;  %v1610_v13 = vld [vmem:[#allocation8 + $0x94] sm:$0xf]  ;;  %v1224_v14 = vld [vmem:[#allocation8 + $0xb4] sm:$0xf0]  ;;  %v1339_v15 = vor.u32 %v1642_v6, %v1338_v5 }
  0x28   :  { %840 = vmatpush.bf16.msra.mxu1 %v1439_v47  ;;  %865 = vmatpush.bf16.msra.mxu3 %v1479_v55  ;;  %v1518_v16 = vld [vmem:[#allocation8 + $0x2d8] sm:$0xf]  ;;  %v1687_v17 = vld [vmem:[#allocation8 + $0x2f8] sm:$0xf0]  ;;  %v1302_v18 = vld [vmem:[#allocation8 + $0x128] sm:$0xf]  ;;  %v1187_v20 = vor.u32 %v1605_v11, %v1186_v9  ;;  %v1227_v23 = vor.u32 %v1610_v13, %v1224_v14 }
  0x29   :  { %v1633_v19 = vld [vmem:[#allocation8 + $0x148] sm:$0xf0]  ;;  %v1150_v21 = vld [vmem:[#allocation8] sm:$0xf]  ;;  %v1596_v22 = vld [vmem:[#allocation8 + $0x20] sm:$0xf0]  ;;  %v1519_v25 = vor.u32 %v1687_v17, %v1518_v16 }
  0x2a   :  { %824 = vmatpush.bf16.msra.mxu0 %v1259_v56  ;;  %849 = vmatpush.bf16.msra.mxu2 %v1299_v59  ;;  %v1656_v24 = vld [vmem:[#allocation8 + $0x204] sm:$0xf]  ;;  %v1601_v26 = vld [vmem:[#allocation8 + $0x4c] sm:$0xf]  ;;  %v1188_v27 = vld [vmem:[#allocation8 + $0x6c] sm:$0xf0]  ;;  %v1303_v29 = vor.u32 %v1633_v19, %v1302_v18  ;;  %v1151_v34 = vor.u32 %v1596_v22, %v1150_v21 }
  0x2b   :  { %v1412_v28 = vld [vmem:[#allocation8 + $0x224] sm:$0xf0]  ;;  %v1482_v30 = vld [vmem:[#allocation8 + $0x290] sm:$0xf]  ;;  %v1678_v31 = vld [vmem:[#allocation8 + $0x2b0] sm:$0xf0]  ;;  %v1191_v35 = vor.u32 %v1601_v26, %v1188_v27 }
  0x2c   :  { %872 = vmatpush.bf16.msrb.mxu1 %v1411_v51  ;;  %866 = vmatpush.bf16.msra.mxu3 %v1443_v7  ;;  %v1266_v32 = vld [vmem:[#allocation8 + $0xe0] sm:$0xf]  ;;  %v1624_v33 = vld [vmem:[#allocation8 + $0x100] sm:$0xf0]  ;;  %v1415_v36 = vor.u32 %v1656_v24, %v1412_v28  ;;  %v1483_v37 = vor.u32 %v1678_v31, %v1482_v30  ;;  %v1647_v38 = vld [vmem:[#allocation8 + $0x1bc] sm:$0xf] }
  0x2d   :  { %v1376_v39 = vld [vmem:[#allocation8 + $0x1dc] sm:$0xf0]  ;;  %v1267_v40 = vor.u32 %v1624_v33, %v1266_v32  ;;  %v1230_v41 = vld [vmem:[#allocation8 + $0x98] sm:$0xf]  ;;  %v1615_v42 = vld [vmem:[#allocation8 + $0xb8] sm:$0xf0] }
  0x2e   :  { %825 = vmatpush.bf16.msra.mxu0 %v1223_v8  ;;  %850 = vmatpush.bf16.msra.mxu2 %v1263_v10  ;;  %v1379_v43 = vor.u32 %v1647_v38, %v1376_v39  ;;  %v1638_v44 = vld [vmem:[#allocation8 + $0x174] sm:$0xf]  ;;  %v1340_v45 = vld [vmem:[#allocation8 + $0x194] sm:$0xf0]  ;;  %v1231_v46 = vor.u32 %v1615_v42, %v1230_v41  ;;  %v1592_v48 = vld [vmem:[#allocation8 + $0x4] sm:$0xf] }
  0x2f   :  { %v1343_v47 = vor.u32 %v1638_v44, %v1340_v45  ;;  %v1152_v49 = vld [vmem:[#allocation8 + $0x24] sm:$0xf0]  ;;  %v1629_v50 = vld [vmem:[#allocation8 + $0x12c] sm:$0xf]  ;;  %v1304_v52 = vld [vmem:[#allocation8 + $0x14c] sm:$0xf0] }
  0x30   :  { %873 = vmatpush.bf16.msrb.mxu1 %v1375_v0  ;;  %889 = vmatpush.bf16.msrb.mxu3 %v1555_v12  ;;  %v1155_v51 = vor.u32 %v1592_v48, %v1152_v49  ;;  %v1692_v53 = vld [vmem:[#allocation8 + $0x324] sm:$0xf]  ;;  %v1556_v54 = vld [vmem:[#allocation8 + $0x344] sm:$0xf0]  ;;  %v1307_v55 = vor.u32 %v1629_v50, %v1304_v52  ;;  %v1194_v57 = vld [vmem:[#allocation8 + $0x50] sm:$0xf] }
  0x31   :  { %v1559_v56 = vor.u32 %v1692_v53, %v1556_v54  ;;  %v1606_v58 = vld [vmem:[#allocation8 + $0x70] sm:$0xf0]  ;;  %v1446_v59 = vld [vmem:[#allocation8 + $0x248] sm:$0xf]  ;;  %v1669_v61 = vld [vmem:[#allocation8 + $0x268] sm:$0xf0] }
  0x32   :  { %826 = vmatpush.bf16.msra.mxu0 %v1187_v20  ;;  %851 = vmatpush.bf16.msra.mxu2 %v1227_v23  ;;  %v1195_v60 = vor.u32 %v1606_v58, %v1194_v57  ;;  %v1447_v62 = vor.u32 %v1669_v61, %v1446_v59  ;;  %v1620_v63 = vld [vmem:[#allocation8 + $0xe4] sm:$0xf]  ;;  %v1268_v0 = vld [vmem:[#allocation8 + $0x104] sm:$0xf0]  ;;  %v1683_v4 = vld [vmem:[#allocation8 + $0x2dc] sm:$0xf] }
  0x33   :  { %v1271_v3 = vor.u32 %v1620_v63, %v1268_v0  ;;  %v1520_v5 = vld [vmem:[#allocation8 + $0x2fc] sm:$0xf0]  ;;  %v1158_v7 = vld [vmem:[#allocation8 + $0x8] sm:$0xf]  ;;  %v1597_v8 = vld [vmem:[#allocation8 + $0x28] sm:$0xf0] }
  0x34   :  { %874 = vmatpush.bf16.msrb.mxu1 %v1339_v15  ;;  %890 = vmatpush.bf16.msrb.mxu3 %v1519_v25  ;;  %v1523_v6 = vor.u32 %v1683_v4, %v1520_v5  ;;  %v1159_v9 = vor.u32 %v1597_v8, %v1158_v7  ;;  %v1611_v10 = vld [vmem:[#allocation8 + $0x9c] sm:$0xf]  ;;  %v1232_v11 = vld [vmem:[#allocation8 + $0xbc] sm:$0xf0]  ;;  %v1674_v13 = vld [vmem:[#allocation8 + $0x294] sm:$0xf]  ;;  %v96_v25 = vmul.f32 %v1944_v1, %v1946_v2 }
  0x35   :  { %v1235_v12 = vor.u32 %v1611_v10, %v1232_v11  ;;  %v1484_v14 = vld [vmem:[#allocation8 + $0x2b4] sm:$0xf0]  ;;  %v1602_v16 = vld [vmem:[#allocation8 + $0x54] sm:$0xf]  ;;  %v1665_v18 = vld [vmem:[#allocation8 + $0x24c] sm:$0xf] }
  0x36   :  { %827 = vmatpush.bf16.msra.mxu0 %v1151_v34  ;;  %852 = vmatpush.bf16.msra.mxu2 %v1191_v35  ;;  %v1487_v15 = vor.u32 %v1674_v13, %v1484_v14  ;;  %v1196_v17 = vld [vmem:[#allocation8 + $0x74] sm:$0xf0]  ;;  %v1448_v19 = vld [vmem:[#allocation8 + $0x26c] sm:$0xf0]  ;;  %v1593_v22 = vld [vmem:[#allocation8 + $0xc] sm:$0xf] }
  0x37   :  { %v1199_v20 = vor.u32 %v1602_v16, %v1196_v17  ;;  %v1451_v21 = vor.u32 %v1665_v18, %v1448_v19  ;;  %v1160_v23 = vld [vmem:[#allocation8 + $0x2c] sm:$0xf0]  ;;  %vm114_vm0 = vcmask 261120   ;;  %v1418_v26 = vld [vmem:[#allocation8 + $0x208] sm:$0xf]  ;;  %vm116_vm1 = vcmask 523264  }
  0x38   :  { %875 = vmatpush.bf16.msrb.mxu1 %v1303_v29  ;;  %891 = vmatpush.bf16.msrb.mxu3 %v1483_v37  ;;  %v1163_v24 = vor.u32 %v1593_v22, %v1160_v23  ;;  %v1661_v28 = vld [vmem:[#allocation8 + $0x228] sm:$0xf0]  ;;  %v1562_v29 = vld [vmem:[#allocation8 + $0x328] sm:$0xf]  ;;  %v1382_v34 = vld [vmem:[#allocation8 + $0x1c0] sm:$0xf] }
  0x39   :  { %v1697_v30 = vld [vmem:[#allocation8 + $0x348] sm:$0xf0]  ;;  %v1419_v33 = vor.u32 %v1661_v28, %v1418_v26  ;;  %v1652_v37 = vld [vmem:[#allocation8 + $0x1e0] sm:$0xf0]  ;;  %v1526_v38 = vld [vmem:[#allocation8 + $0x2e0] sm:$0xf] }
  0x3a   :  { %898 = vmatpush.bf16.msrb.mxu0 %v1415_v36  ;;  %853 = vmatpush.bf16.msra.mxu2 %v1155_v51  ;;  %v1563_v35 = vor.u32 %v1697_v30, %v1562_v29  ;;  %v1688_v39 = vld [vmem:[#allocation8 + $0x300] sm:$0xf0]  ;;  %v1383_v1 = vor.u32 %v1652_v37, %v1382_v34  ;;  %v1643_v42 = vld [vmem:[#allocation8 + $0x198] sm:$0xf0]  ;;  %vm118_vm2 = vcmask 785408   ;;  %s1898_s18 = smov [#allocation11]  }
  0x3b   :  { %v1527_v41 = vor.u32 %v1688_v39, %v1526_v38  ;;  %v1679_v44 = vld [vmem:[#allocation8 + $0x2b8] sm:$0xf0]  ;;  %v1657_v45 = vld [vmem:[#allocation8 + $0x20c] sm:$0xf]  ;;  %v1420_v48 = vld [vmem:[#allocation8 + $0x22c] sm:$0xf0] }
  0x3c   :  { %876 = vmatpush.bf16.msrb.mxu1 %v1267_v40  ;;  %892 = vmatpush.bf16.msrb.mxu3 %v1447_v62  ;;  %v1346_v40 = vld [vmem:[#allocation8 + $0x178] sm:$0xf]  ;;  %v1693_v49 = vld [vmem:[#allocation8 + $0x32c] sm:$0xf]  ;;  %v1564_v50 = vld [vmem:[#allocation8 + $0x34c] sm:$0xf0] }
  0x3d   :  { %v1347_v52 = vor.u32 %v1643_v42, %v1346_v40  ;;  %v1310_v53 = vld [vmem:[#allocation8 + $0x130] sm:$0xf]  ;;  %v1670_v58 = vld [vmem:[#allocation8 + $0x270] sm:$0xf0]  ;;  %v1567_v61 = vor.u32 %v1693_v49, %v1564_v50  ;;  %v1648_v62 = vld [vmem:[#allocation8 + $0x1c4] sm:$0xf] }
  0x3e   :  { %899 = vmatpush.bf16.msrb.mxu0 %v1379_v43  ;;  %915 = vmatpush.bf16.msrb.mxu2 %v1559_v56  ;;  %v1490_v43 = vld [vmem:[#allocation8 + $0x298] sm:$0xf]  ;;  %v1634_v56 = vld [vmem:[#allocation8 + $0x150] sm:$0xf0]  ;;  %v1454_v57 = vld [vmem:[#allocation8 + $0x250] sm:$0xf] }
  0x3f   :  { %v1491_v54 = vor.u32 %v1679_v44, %v1490_v43  ;;  %v1384_v0 = vld [vmem:[#allocation8 + $0x1e4] sm:$0xf0]  ;;  %v1311_v4 = vor.u32 %v1634_v56, %v1310_v53  ;;  %v1625_v7 = vld [vmem:[#allocation8 + $0x108] sm:$0xf0]  ;;  %v1426_v8 = vld [vmem:[#allocation8 + $0x210] sm:$0xf] }
  0x40   :  { %877 = vmatpush.bf16.msrb.mxu1 %v1231_v46  ;;  %v1274_v5 = vld [vmem:[#allocation8 + $0xe8] sm:$0xf]  ;;  %v1387_v10 = vor.u32 %v1648_v62, %v1384_v0  ;;  %v1348_v13 = vld [vmem:[#allocation8 + $0x19c] sm:$0xf0]  ;;  %v1675_v14 = vld [vmem:[#allocation8 + $0x29c] sm:$0xf] }
  0x41   :  { %v1275_v16 = vor.u32 %v1625_v7, %v1274_v5  ;;  %v1238_v18 = vld [vmem:[#allocation8 + $0xa0] sm:$0xf]  ;;  %v1616_v19 = vld [vmem:[#allocation8 + $0xc0] sm:$0xf0]  ;;  %v1666_v26 = vld [vmem:[#allocation8 + $0x254] sm:$0xf] }
  0x42   :  { %900 = vmatpush.bf16.msrb.mxu0 %v1343_v47  ;;  %916 = vmatpush.bf16.msrb.mxu2 %v1523_v6  ;;  %v1455_v6 = vor.u32 %v1670_v58, %v1454_v57  ;;  %v1239_v28 = vor.u32 %v1616_v19, %v1238_v18  ;;  %v1202_v30 = vld [vmem:[#allocation8 + $0x58] sm:$0xf]  ;;  %v1621_v37 = vld [vmem:[#allocation8 + $0xec] sm:$0xf]  ;;  %v1276_v38 = vld [vmem:[#allocation8 + $0x10c] sm:$0xf0] }
  0x43   :  { %v1658_v39 = vld [vmem:[#allocation8 + $0x214] sm:$0xf]  ;;  %v1166_v42 = vld [vmem:[#allocation8 + $0x10] sm:$0xf]  ;;  %v1318_v44 = vld [vmem:[#allocation8 + $0x138] sm:$0xf] }
  0x44   :  { %878 = vmatpush.bf16.msrb.mxu1 %v1195_v60  ;;  %v1423_v60 = vor.u32 %v1657_v45, %v1420_v48  ;;  %v1598_v43 = vld [vmem:[#allocation8 + $0x30] sm:$0xf0]  ;;  %v1635_v45 = vld [vmem:[#allocation8 + $0x158] sm:$0xf0]  ;;  %v1570_v48 = vld [vmem:[#allocation8 + $0x330] sm:$0xf] }
  0x45   :  { %v1698_v49 = vld [vmem:[#allocation8 + $0x350] sm:$0xf0]  ;;  %v1612_v50 = vld [vmem:[#allocation8 + $0xa4] sm:$0xf]  ;;  %v1392_v53 = vld [vmem:[#allocation8 + $0x1ec] sm:$0xf0] }
  0x46   :  { %901 = vmatpush.bf16.msrb.mxu0 %v1307_v55  ;;  %917 = vmatpush.bf16.msrb.mxu2 %v1487_v15  ;;  %v1492_v15 = vld [vmem:[#allocation8 + $0x2bc] sm:$0xf0]  ;;  %v1571_v56 = vor.u32 %v1698_v49, %v1570_v48  ;;  %v1282_v57 = vld [vmem:[#allocation8 + $0xf0] sm:$0xf]  ;;  %v1626_v58 = vld [vmem:[#allocation8 + $0x110] sm:$0xf0] }
  0x47   :  { %v1495_v23 = vor.u32 %v1675_v14, %v1492_v15  ;;  %v1689_v62 = vld [vmem:[#allocation8 + $0x308] sm:$0xf0]  ;;  %v1603_v0 = vld [vmem:[#allocation8 + $0x5c] sm:$0xf]  ;;  %v1283_v5 = vor.u32 %v1626_v58, %v1282_v57  ;;  %v1246_v7 = vld [vmem:[#allocation8 + $0xa8] sm:$0xf] }
  0x48   :  { %879 = vmatpush.bf16.msrb.mxu1 %v1159_v9  ;;  %v1662_v9 = vld [vmem:[#allocation8 + $0x230] sm:$0xf0]  ;;  %v1168_v14 = vld [vmem:[#allocation8 + $0x34] sm:$0xf0]  ;;  %v1631_v15 = vld [vmem:[#allocation8 + $0x13c] sm:$0xf] }
  0x49   :  { %v1427_v17 = vor.u32 %v1662_v9, %v1426_v8  ;;  %v1617_v8 = vld [vmem:[#allocation8 + $0xc8] sm:$0xf0]  ;;  %v1694_v18 = vld [vmem:[#allocation8 + $0x334] sm:$0xf]  ;;  %v1572_v19 = vld [vmem:[#allocation8 + $0x354] sm:$0xf0] }
  0x4a   :  { %902 = vmatpush.bf16.msrb.mxu0 %v1271_v3  ;;  %918 = vmatpush.bf16.msrb.mxu2 %v1451_v21  ;;  %v1684_v3 = vld [vmem:[#allocation8 + $0x2e4] sm:$0xf]  ;;  %v1653_v21 = vld [vmem:[#allocation8 + $0x1e8] sm:$0xf0]  ;;  %v1212_v58 = vld [vmem:[#allocation8 + $0x84] sm:$0xf0] }
  0x4b   :  { %v1676_v49 = vld [vmem:[#allocation8 + $0x2a4] sm:$0xf]  ;;  %s1134_s19 = sshll.u32 %s1898_s18, 4  ;;  %s1136_s22 = sshll.u32 %s2021_s5, 4  ;;  %s1135_s19 = int_to_ptr.vmem [resolvable:$true] %s1134_s19  ;;  %s1137_s22 = int_to_ptr.hbm [resolvable:$true] %s1136_s22 }
  0x4c   :  { %v1604_v57 = vld [vmem:[#allocation8 + $0x64] sm:$0xf] }
  0x4e   :  { %903 = vmatpush.bf16.msrb.mxu0 %v1235_v12  ;;  %v1639_v12 = vld [vmem:[#allocation8 + $0x17c] sm:$0xf] }
  0x4f   :  { %v1351_v22 = vor.u32 %v1639_v12, %v1348_v13  ;;  %v1680_v12 = vld [vmem:[#allocation8 + $0x2c0] sm:$0xf0]  ;;  %v1594_v13 = vld [vmem:[#allocation8 + $0x14] sm:$0xf] }
  0x52   :  { %904 = vmatpush.bf16.msrb.mxu0 %v1199_v20  ;;  %v1390_v20 = vld [vmem:[#allocation8 + $0x1c8] sm:$0xf] }
  0x53   :  { %v1391_v29 = vor.u32 %v1653_v21, %v1390_v20  ;;  %v1210_v21 = vld [vmem:[#allocation8 + $0x60] sm:$0xf] }
  0x56   :  { %905 = vmatpush.bf16.msrb.mxu0 %v1163_v24  ;;  %v1630_v24 = vld [vmem:[#allocation8 + $0x134] sm:$0xf] }
  0x89   :  { %v104_v27 = vpop.permute.xlu1 %103 }
  0x8b   :  { %v112_v31 = vpop.permute.xlu0 %111 }
  0x8c   :  { %v120_v32 = vsel %vm114_vm0, %v96_v25, %v112_v31  ;;  %v1312_v25 = vld [vmem:[#allocation8 + $0x154] sm:$0xf0]  ;;  %v1607_v31 = vld [vmem:[#allocation8 + $0x78] sm:$0xf0] }
  0x8d   :  { %v1956_v36 = vpack.c.bf16 %v120_v32, %v120_v32  ;;  %v1354_v32 = vld [vmem:[#allocation8 + $0x180] sm:$0xf]  ;;  %v1315_v34 = vor.u32 %v1630_v24, %v1312_v25  ;;  %v1203_v40 = vor.u32 %v1607_v31, %v1202_v30  ;;  %v1462_v25 = vld [vmem:[#allocation8 + $0x258] sm:$0xf]  ;;  %v1575_v30 = vor.u32 %v1694_v18, %v1572_v19  ;;  %v1254_v19 = vld [vmem:[#allocation8 + $0xb0] sm:$0xf] }
  0x8f   :  { %1580 = vmatmul.msk.bf16.vlgmr.msra.gmra.mxu1 %vm116_vm1, %v1956_v36  ;;  %1581 = vmatmul.msk.bf16.vlgmr.msra.gmra.mxu3 %vm116_vm1, %v1956_v36 }
  0x90   :  { %924 = vmatpush.bf16.msra.mxu3 %v1419_v33  ;;  %941 = vmatpush.bf16.msra.mxu1 %v1563_v35  ;;  %v1644_v33 = vld [vmem:[#allocation8 + $0x1a0] sm:$0xf0] }
  0x91   :  { %v108_v47 = vpop.permute.xlu1 %107 }
  0x93   :  { %v100_v46 = vpop.permute.xlu0 %99 }
  0x94   :  { %v115_v51 = vsel %vm114_vm0, %v1946_v2, %v100_v46  ;;  %925 = vmatpush.bf16.msra.mxu3 %v1383_v1  ;;  %942 = vmatpush.bf16.msra.mxu1 %v1527_v41  ;;  %v1528_v2 = vld [vmem:[#allocation8 + $0x304] sm:$0xf0]  ;;  %v1428_v1 = vld [vmem:[#allocation8 + $0x234] sm:$0xf0]  ;;  %v1355_v41 = vor.u32 %v1644_v33, %v1354_v32  ;;  %v1279_v46 = vor.u32 %v1621_v37, %v1276_v38  ;;  %v1685_v33 = vld [vmem:[#allocation8 + $0x2ec] sm:$0xf] }
  0x95   :  { %v117_v55 = vsel %vm116_vm1, %v115_v51, %v104_v27  ;;  %v1531_v11 = vor.u32 %v1684_v3, %v1528_v2  ;;  %v1456_v27 = vld [vmem:[#allocation8 + $0x274] sm:$0xf0]  ;;  %v1240_v51 = vld [vmem:[#allocation8 + $0xc4] sm:$0xf0]  ;;  %v1204_v3 = vld [vmem:[#allocation8 + $0x7c] sm:$0xf0] }
  0x96   :  { %v119_v59 = vsel %vm118_vm2, %v117_v55, %v108_v47  ;;  %v1459_v35 = vor.u32 %v1666_v26, %v1456_v27  ;;  %v1431_v47 = vor.u32 %v1658_v39, %v1428_v1  ;;  %v1319_v55 = vor.u32 %v1635_v45, %v1318_v44  ;;  %v1640_v2 = vld [vmem:[#allocation8 + $0x184] sm:$0xf]  ;;  %v1671_v26 = vld [vmem:[#allocation8 + $0x278] sm:$0xf0]  ;;  %v1434_v27 = vld [vmem:[#allocation8 + $0x218] sm:$0xf] }
  0x97   :  { %v1966_v63 = vpack.c.bf16 %v119_v59, %v119_v59  ;;  %v1243_v59 = vor.u32 %v1612_v50, %v1240_v51  ;;  %v1207_v9 = vor.u32 %v1603_v0, %v1204_v3  ;;  %v1284_v32 = vld [vmem:[#allocation8 + $0x114] sm:$0xf0]  ;;  %v1599_v38 = vld [vmem:[#allocation8 + $0x38] sm:$0xf0]  ;;  %v1500_v50 = vld [vmem:[#allocation8 + $0x2c4] sm:$0xf0] }
  0x98   :  { %926 = vmatpush.bf16.msra.mxu3 %v1347_v52  ;;  %943 = vmatpush.bf16.msra.mxu1 %v1491_v54  ;;  %v1649_v52 = vld [vmem:[#allocation8 + $0x1cc] sm:$0xf]  ;;  %v1167_v54 = vor.u32 %v1598_v43, %v1166_v42  ;;  %v1174_v37 = vld [vmem:[#allocation8 + $0x18] sm:$0xf]  ;;  %v1398_v42 = vld [vmem:[#allocation8 + $0x1d0] sm:$0xf] }
  0x99   :  { %828 = vmatmul.bf16.vlgmr.msra.gmra.mxu0 %v1966_v63  ;;  %854 = vmatmul.bf16.vlgmr.msra.gmra.mxu2 %v1966_v63  ;;  %v1578_v1 = vld [vmem:[#allocation8 + $0x338] sm:$0xf]  ;;  %v1654_v43 = vld [vmem:[#allocation8 + $0x1f0] sm:$0xf0]  ;;  %v1175_v45 = vor.u32 %v1599_v38, %v1174_v37  ;;  %v1506_v3 = vld [vmem:[#allocation8 + $0x2a8] sm:$0xf] }
  0x9a   :  { %950 = vmatpush.bf16.msra.mxu2 %v1423_v60  ;;  %967 = vmatpush.bf16.msra.mxu0 %v1567_v61  ;;  %v1395_v60 = vor.u32 %v1649_v52, %v1392_v53  ;;  %v1534_v61 = vld [vmem:[#allocation8 + $0x2e8] sm:$0xf]  ;;  %v1399_v51 = vor.u32 %v1654_v43, %v1398_v42  ;;  %v1542_v52 = vld [vmem:[#allocation8 + $0x2f0] sm:$0xf]  ;;  %v1690_v53 = vld [vmem:[#allocation8 + $0x310] sm:$0xf0] }
  0x9c   :  { %927 = vmatpush.bf16.msra.mxu3 %v1311_v4  ;;  %944 = vmatpush.bf16.msra.mxu1 %v1455_v6  ;;  %v1356_v4 = vld [vmem:[#allocation8 + $0x1a4] sm:$0xf0]  ;;  %v1535_v6 = vor.u32 %v1689_v62, %v1534_v61  ;;  %v1667_v61 = vld [vmem:[#allocation8 + $0x25c] sm:$0xf]  ;;  %v1464_v62 = vld [vmem:[#allocation8 + $0x27c] sm:$0xf0] }
  0x9e   :  { %951 = vmatpush.bf16.msra.mxu2 %v1387_v10  ;;  %968 = vmatpush.bf16.msra.mxu0 %v1531_v11  ;;  %v1359_v10 = vor.u32 %v1640_v2, %v1356_v4  ;;  %v1498_v11 = vld [vmem:[#allocation8 + $0x2a0] sm:$0xf]  ;;  %v1681_v2 = vld [vmem:[#allocation8 + $0x2c8] sm:$0xf0]  ;;  %v1215_v4 = vor.u32 %v1604_v57, %v1212_v58 }
  0x9f   :  { %880 = vmatmul.bf16.vlgmr.msrb.gmra.mxu1 %v1966_v63  ;;  %1582 = vmatmul.msk.bf16.vlgmr.msrb.gmra.mxu3 %vm116_vm1, %v1956_v36  ;;  %v1499_v20 = vor.u32 %v1680_v12, %v1498_v11  ;;  %v1470_v12 = vld [vmem:[#allocation8 + $0x260] sm:$0xf] }
  0xa0   :  { %928 = vmatpush.bf16.msra.mxu3 %v1275_v16  ;;  %976 = vmatpush.bf16.msrb.mxu1 %v1427_v17  ;;  %v1320_v16 = vld [vmem:[#allocation8 + $0x15c] sm:$0xf0]  ;;  %v1247_v17 = vor.u32 %v1617_v8, %v1246_v7  ;;  %v1595_v7 = vld [vmem:[#allocation8 + $0x1c] sm:$0xf] }
  0xa1   :  { %v1323_v24 = vor.u32 %v1631_v15, %v1320_v16  ;;  %v1176_v8 = vld [vmem:[#allocation8 + $0x3c] sm:$0xf0]  ;;  %v1290_v15 = vld [vmem:[#allocation8 + $0xf8] sm:$0xf]  ;;  %v1627_v16 = vld [vmem:[#allocation8 + $0x118] sm:$0xf0] }
  0xa2   :  { %952 = vmatpush.bf16.msra.mxu2 %v1351_v22  ;;  %969 = vmatpush.bf16.msra.mxu0 %v1495_v23  ;;  %v1608_v22 = vld [vmem:[#allocation8 + $0x80] sm:$0xf0]  ;;  %v1171_v23 = vor.u32 %v1594_v13, %v1168_v14  ;;  %v1179_v14 = vor.u32 %v1595_v7, %v1176_v8  ;;  %v1291_v18 = vor.u32 %v1627_v16, %v1290_v15 }
  0xa3   :  { %v1211_v31 = vor.u32 %v1608_v22, %v1210_v21  ;;  %v1672_v13 = vld [vmem:[#allocation8 + $0x280] sm:$0xf0]  ;;  %v1218_v22 = vld [vmem:[#allocation8 + $0x68] sm:$0xf] }
  0xa4   :  { %929 = vmatpush.bf16.msra.mxu3 %v1239_v28  ;;  %977 = vmatpush.bf16.msrb.mxu1 %v1391_v29  ;;  %v1663_v28 = vld [vmem:[#allocation8 + $0x238] sm:$0xf0]  ;;  %v1622_v29 = vld [vmem:[#allocation8 + $0xf4] sm:$0xf] }
  0xa5   :  { %v1435_v39 = vor.u32 %v1663_v28, %v1434_v27 }
  0xa6   :  { %953 = vmatpush.bf16.msra.mxu2 %v1315_v34  ;;  %970 = vmatpush.bf16.msra.mxu0 %v1459_v35  ;;  %v1536_v34 = vld [vmem:[#allocation8 + $0x30c] sm:$0xf0]  ;;  %v1463_v35 = vor.u32 %v1671_v26, %v1462_v25  ;;  %v1182_v25 = vld [vmem:[#allocation8 + $0x20] sm:$0xf]  ;;  %v1600_v26 = vld [vmem:[#allocation8 + $0x40] sm:$0xf0] }
  0xa7   :  { %v1539_v44 = vor.u32 %v1685_v33, %v1536_v34  ;;  %v1183_v27 = vor.u32 %v1600_v26, %v1182_v25  ;;  %v1711_v26 = vld [vmem:[#allocation10 + $0x8] ss:$0 sm:$0xff] }
  0xa8   :  { %930 = vmatpush.bf16.msra.mxu3 %v1203_v40  ;;  %978 = vmatpush.bf16.msrb.mxu1 %v1355_v41  ;;  %v1699_v40 = vld [vmem:[#allocation8 + $0x358] sm:$0xf0]  ;;  %v1287_v41 = vor.u32 %v1622_v29, %v1284_v32  ;;  %v1991_v32 = vld [vmem:[#allocation10] sm:$0xff] }
  0xa9   :  { %906 = vmatmul.bf16.vlgmr.msrb.gmra.mxu0 %v1966_v63  ;;  %1583 = vmatmul.msk.bf16.vlgmr.msrb.gmra.mxu2 %vm116_vm1, %v1956_v36  ;;  %v1579_v48 = vor.u32 %v1699_v40, %v1578_v1  ;;  %v248_v33 = vperm.slane %v1991_v32, 1  ;;  %v247_v8 = vperm.slane %v1991_v32, 0 }
  0xaa   :  { %954 = vmatpush.bf16.msra.mxu2 %v1279_v46  ;;  %1002 = vmatpush.bf16.msrb.mxu0 %v1431_v47  ;;  %v1613_v46 = vld [vmem:[#allocation8 + $0xac] sm:$0xf]  ;;  %v1248_v47 = vld [vmem:[#allocation8 + $0xcc] sm:$0xf0] }
  0xac   :  { %931 = vmatpush.bf16.msra.mxu3 %v1167_v54  ;;  %979 = vmatpush.bf16.msrb.mxu1 %v1319_v55  ;;  %v1251_v54 = vor.u32 %v1613_v46, %v1248_v47  ;;  %v1362_v55 = vld [vmem:[#allocation8 + $0x188] sm:$0xf] }
  0xae   :  { %955 = vmatpush.bf16.msra.mxu2 %v1243_v59  ;;  %1003 = vmatpush.bf16.msrb.mxu0 %v1395_v60  ;;  %v1503_v59 = vor.u32 %v1676_v49, %v1500_v50  ;;  %v1543_v60 = vor.u32 %v1690_v53, %v1542_v52 }
  0xaf   :  { %932 = vmatmul.bf16.vlgmr.msra.gmra.mxu3 %v1966_v63  ;;  %1584 = vmatmul.msk.bf16.vlgmr.msra.gmra.mxu1 %vm116_vm1, %v1956_v36 }
  0xb0   :  { %993 = vmatpush.bf16.msrb.mxu3 %v1571_v56  ;;  %980 = vmatpush.bf16.msrb.mxu1 %v1283_v5  ;;  %v1645_v56 = vld [vmem:[#allocation8 + $0x1a8] sm:$0xf0]  ;;  %v1326_v5 = vld [vmem:[#allocation8 + $0x140] sm:$0xf] }
  0xb1   :  { %v1363_v0 = vor.u32 %v1645_v56, %v1362_v55  ;;  %v253_v56 = vperm.slane %v1991_v32, 6 }
  0xb2   :  { %956 = vmatpush.bf16.msra.mxu2 %v1207_v9  ;;  %1004 = vmatpush.bf16.msrb.mxu0 %v1359_v10  ;;  %v1467_v9 = vor.u32 %v1667_v61, %v1464_v62  ;;  %v1507_v10 = vor.u32 %v1681_v2, %v1506_v3  ;;  %v254_v3 = vperm.slane %v1991_v32, 7 }
  0xb4   :  { %994 = vmatpush.bf16.msrb.mxu3 %v1535_v6  ;;  %981 = vmatpush.bf16.msrb.mxu1 %v1247_v17  ;;  %v1636_v6 = vld [vmem:[#allocation8 + $0x160] sm:$0xf0]  ;;  %v1471_v17 = vor.u32 %v1672_v13, %v1470_v12 }
  0xb5   :  { %v1327_v11 = vor.u32 %v1636_v6, %v1326_v5 }
  0xb6   :  { %957 = vmatpush.bf16.msra.mxu2 %v1171_v23  ;;  %1005 = vmatpush.bf16.msrb.mxu0 %v1323_v24  ;;  %v1609_v23 = vld [vmem:[#allocation8 + $0x88] sm:$0xf0] }
  0xb7   :  { %v1219_v24 = vor.u32 %v1609_v23, %v1218_v22 }
  0xb8   :  { %995 = vmatpush.bf16.msrb.mxu3 %v1499_v20  ;;  %982 = vmatpush.bf16.msrb.mxu1 %v1211_v31  ;;  %v1618_v20 = vld [vmem:[#allocation8 + $0xd0] sm:$0xf0] }
  0xb9   :  { %958 = vmatmul.bf16.vlgmr.msra.gmra.mxu2 %v1966_v63  ;;  %1585 = vmatmul.msk.bf16.vlgmr.msra.gmra.mxu0 %vm116_vm1, %v1956_v36  ;;  %v1255_v21 = vor.u32 %v1618_v20, %v1254_v19 }
  0xba   :  { %1019 = vmatpush.bf16.msrb.mxu2 %v1575_v30  ;;  %1006 = vmatpush.bf16.msrb.mxu0 %v1287_v41 }
  0xbc   :  { %996 = vmatpush.bf16.msrb.mxu3 %v1463_v35  ;;  %983 = vmatpush.bf16.msrb.mxu1 %v1175_v45  ;;  %v249_v35 = vperm.slane %v1991_v32, 2 }
  0xbe   :  { %1020 = vmatpush.bf16.msrb.mxu2 %v1539_v44  ;;  %1007 = vmatpush.bf16.msrb.mxu0 %v1251_v54 }
  0xbf   :  { %984 = vmatmul.bf16.vlgmr.msrb.gmra.mxu1 %v1966_v63  ;;  %1586 = vmatmul.msk.bf16.vlgmr.msrb.gmra.mxu3 %vm116_vm1, %v1956_v36 }
  0xc0   :  { %1028 = vmatpush.bf16.msra.mxu3 %v1435_v39  ;;  %1045 = vmatpush.bf16.msra.mxu1 %v1579_v48 }
  0xc2   :  { %1021 = vmatpush.bf16.msrb.mxu2 %v1503_v59  ;;  %1008 = vmatpush.bf16.msrb.mxu0 %v1215_v4 }
  0xc4   :  { %1029 = vmatpush.bf16.msra.mxu3 %v1399_v51  ;;  %1046 = vmatpush.bf16.msra.mxu1 %v1543_v60 }
  0xc6   :  { %1022 = vmatpush.bf16.msrb.mxu2 %v1467_v9  ;;  %1009 = vmatpush.bf16.msrb.mxu0 %v1179_v14  ;;  %v250_v9 = vperm.slane %v1991_v32, 3 }
  0xc8   :  { %1030 = vmatpush.bf16.msra.mxu3 %v1363_v0  ;;  %1047 = vmatpush.bf16.msra.mxu1 %v1507_v10 }
  0xc9   :  { %1587 = vmatmul.msk.bf16.vlgmr.msrb.gmra.mxu2 %vm116_vm1, %v1956_v36  ;;  %1010 = vmatmul.bf16.vlgmr.msrb.gmra.mxu0 %v1966_v63 }
  0xcc   :  { %1031 = vmatpush.bf16.msra.mxu3 %v1327_v11  ;;  %1048 = vmatpush.bf16.msra.mxu1 %v1471_v17 }
  0xcf   :  { %1588 = vmatmul.msk.bf16.vlgmr.msra.gmra.mxu1 %vm116_vm1, %v1956_v36 }
  0xd0   :  { %1032 = vmatpush.bf16.msra.mxu3 %v1291_v18 }
  0xd4   :  { %1033 = vmatpush.bf16.msra.mxu3 %v1255_v21  ;;  %v251_v21 = vperm.slane %v1991_v32, 4 }
  0xd8   :  { %1034 = vmatpush.bf16.msra.mxu3 %v1219_v24 }
  0xdc   :  { %1035 = vmatpush.bf16.msra.mxu3 %v1183_v27 }
  0xdf   :  { %1036 = vmatmul.bf16.vlgmr.msra.gmra.mxu3 %v1966_v63 }
 0x10c   :  { %v842_v28 = vpop.f32.mrf.mxu1 }
 0x112   :  { %v868_v29 = vpop.f32.mrf.mxu3 }
 0x114   :  { %v844_v30 = vpop.f32.mrf.mxu1 }
 0x116   :  { %v829_v31 = vpop.f32.mrf.mxu0 }
 0x117   :  { %v830_v15 = vadd.f32 %v829_v31, %v247_v8 }
 0x119   :  { %v843_v20 = vadd.f32 %v842_v28, %v830_v15 }
 0x11a   :  { %v870_v34 = vpop.f32.mrf.mxu3 }
 0x11c   :  { %v855_v37 = vpop.f32.mrf.mxu2  ;;  %v881_v36 = vpop.f32.mrf.mxu1 }
 0x11d   :  { %v856_v38 = vadd.f32 %v855_v37, %v248_v33  ;;  %v882_v40 = vadd.f32 %v881_v36, %v249_v35 }
 0x11e   :  { %v831_v39 = vpop.f32.mrf.mxu0 }
 0x11f   :  { %v1995_v1 = vadd.f32 %v868_v29, %v856_v38 }
 0x122   :  { %v894_v41 = vpop.f32.mrf.mxu3 }
 0x123   :  { %v1997_v63 = vadd.f32 %v894_v41, %v882_v40 }
 0x124   :  { %v857_v42 = vpop.f32.mrf.mxu2  ;;  %v883_v43 = vpop.f32.mrf.mxu1 }
 0x126   :  { %v907_v44 = vpop.f32.mrf.mxu0 }
 0x127   :  { %v908_v16 = vadd.f32 %v907_v44, %v250_v9 }
 0x12a   :  { %v896_v45 = vpop.f32.mrf.mxu3 }
 0x12c   :  { %v920_v46 = vpop.f32.mrf.mxu2  ;;  %v946_v47 = vpop.f32.mrf.mxu1 }
 0x12d   :  { %v921_v17 = vadd.f32 %v920_v46, %v908_v16 }
 0x12e   :  { %v909_v48 = vpop.f32.mrf.mxu0 }
 0x132   :  { %v933_v49 = vpop.f32.mrf.mxu3 }
 0x133   :  { %v934_v27 = vadd.f32 %v933_v49, %v251_v21 }
 0x134   :  { %v922_v50 = vpop.f32.mrf.mxu2  ;;  %v948_v51 = vpop.f32.mrf.mxu1 }
 0x135   :  { %v947_v28 = vadd.f32 %v946_v47, %v934_v27 }
 0x136   :  { %v1999_v52 = vpop.f32.mrf.mxu0 }
 0x13a   :  { %v935_v53 = vpop.f32.mrf.mxu3 }
 0x13b   :  { %v252_v53 = vperm.slane %v1991_v32, 5 }
 0x13c   :  { %v2001_v54 = vpop.f32.mrf.mxu2  ;;  %v985_v55 = vpop.f32.mrf.mxu1 }
 0x13d   :  { %v986_v58 = vadd.f32 %v985_v55, %v253_v56 }
 0x13e   :  { %v974_v57 = vpop.f32.mrf.mxu0 }
 0x142   :  { %v998_v59 = vpop.f32.mrf.mxu3 }
 0x143   :  { %v999_v60 = vadd.f32 %v998_v59, %v986_v58 }
 0x144   :  { %v961_v61 = vpop.f32.mrf.mxu2  ;;  %v987_v62 = vpop.f32.mrf.mxu1 }
 0x145   :  { %v1589_v0 = vmul.f32 -1.442695, %v999_v60  ;;  %v960_v62 = vadd.f32 %v2001_v54, %v252_v53 }
 0x146   :  { %v1011_v2 = vpop.f32.mrf.mxu0 }
 0x147   :  { %1712 = vpow2.f32 %v1589_v0  ;;  %v1012_v4 = vadd.f32 %v1011_v2, %v254_v3 }
 0x14a   :  { %v1000_v5 = vpop.f32.mrf.mxu3 }
 0x14c   :  { %v1024_v6 = vpop.f32.mrf.mxu2  ;;  %v1050_v7 = vpop.f32.mrf.mxu1 }
 0x14d   :  { %v1025_v10 = vadd.f32 %v1024_v6, %v1012_v4  ;;  %v1713_v11 = vpop.eup %1712  ;;  %v973_v4 = vadd.f32 %v1999_v52, %v960_v62 }
 0x14e   :  { %v1069_v12 = vadd.f32 1.0, %v1713_v11  ;;  %v1013_v14 = vpop.f32.mrf.mxu0 }
 0x14f   :  { %v1590_v13 = vmul.f32 -1.442695, %v1025_v10 }
 0x150   :  { %1714 = vrcp.f32 %v1069_v12  ;;  %v1083_v30 = vand.u32 2147483648, %v1069_v12  ;;  %v1081_v33 = vand.u32 2147483647, %v1069_v12  ;;  %vm1077_vm4 = vweird.f32 %v1069_v12 }
 0x151   :  { %1716 = vpow2.f32 %v1590_v13 }
 0x152   :  { %1718 = vtanh.f32 %v921_v17  ;;  %v1084_v39 = vor.u32 1.1754944e-38, %v1083_v30  ;;  %vm1082_vm6 = vcmp.eq.f32.partialorder %v1081_v33, 8.507059e+37 }
 0x153   :  { %1720 = vtanh.f32 %v843_v20 }
 0x154   :  { %v1026_v18 = vpop.f32.mrf.mxu2  ;;  %v1052_v19 = vpop.f32.mrf.mxu1 }
 0x156   :  { %v1715_v22 = vpop.eup %1714 }
 0x157   :  { %v1717_v23 = vpop.eup %1716  ;;  %v1073_v24 = vmul.f32 %v1715_v22, %v1069_v12  ;;  %vm1078_vm3 = vweird.f32 %v1715_v22 }
 0x158   :  { %v1070_v25 = vadd.f32 1.0, %v1717_v23  ;;  %v1719_v35 = vpop.eup %1718  ;;  %vm1079_vm5 = vmor %vm1077_vm4, %vm1078_vm3 }
 0x159   :  { %v1074_v29 = vsub.f32 1.0, %v1073_v24  ;;  %v1721_v38 = vpop.eup %1720 }
 0x15a   :  { %1722 = vrcp.f32 %v1070_v25  ;;  %v1117_v41 = vsub.f32 %v1721_v38, %v1719_v35  ;;  %v1098_v51 = vand.u32 2147483648, %v1070_v25  ;;  %v1096_v56 = vand.u32 2147483647, %v1070_v25 }
 0x15b   :  { %v1075_v31 = vmul.f32 %v1715_v22, %v1074_v29  ;;  %1724 = vtanh.f32 %v947_v28  ;;  %vm1092_vm8 = vweird.f32 %v1070_v25 }
 0x15c   :  { %v1099_v60 = vor.u32 1.1754944e-38, %v1098_v51  ;;  %vm1097_vm10 = vcmp.eq.f32.partialorder %v1096_v56, 8.507059e+37 }
 0x15d   :  { %v1076_v36 = vadd.f32 %v1715_v22, %v1075_v31 }
 0x15f   :  { %v1080_v42 = vsel %vm1079_vm5, %v1715_v22, %v1076_v36 }
 0x160   :  { %v1723_v43 = vpop.eup %1722  ;;  %v1085_v45 = vsel %vm1082_vm6, %v1084_v39, %v1080_v42 }
 0x161   :  { %v1088_v46 = vmul.f32 %v1723_v43, %v1070_v25  ;;  %v1120_v48 = vmul.f32 %v1117_v41, %v1085_v45  ;;  %vm1093_vm7 = vweird.f32 %v1723_v43  ;;  %v1725_v57 = vpop.eup %1724 }
 0x162   :  { %v1037_v34 = vpop.f32.mrf.mxu3  ;;  %vm1094_vm9 = vmor %vm1092_vm8, %vm1093_vm7 }
 0x163   :  { %v1038_v37 = vadd.f32 %v1711_v26, %v1037_v34  ;;  %v1089_v49 = vsub.f32 1.0, %v1088_v46  ;;  %v1123_v50 = vadd.f32 %v1719_v35, %v1120_v48 }
 0x165   :  { %v1051_v40 = vadd.f32 %v1050_v7, %v1038_v37  ;;  %v1090_v55 = vmul.f32 %v1723_v43, %v1089_v49  ;;  %1126 = vst [vmem:[#allocation11] sm:$0xff] %v1123_v50 }
 0x167   :  { %v1591_v44 = vmul.f32 -1.442695, %v1051_v40  ;;  %v1091_v58 = vadd.f32 %v1723_v43, %v1090_v55 }
 0x169   :  { %1726 = vpow2.f32 %v1591_v44  ;;  %v1095_v0 = vsel %vm1094_vm9, %v1723_v43, %v1091_v58 }
 0x16a   :  { %1728 = vtanh.f32 %v1995_v1  ;;  %v1039_v47 = vpop.f32.mrf.mxu3  ;;  %v1100_v2 = vsel %vm1097_vm10, %v1099_v60, %v1095_v0 }
 0x16f   :  { %v1727_v59 = vpop.eup %1726 }
 0x170   :  { %v1729_v61 = vpop.eup %1728  ;;  %v1071_v1 = vadd.f32 1.0, %v1727_v59 }
 0x171   :  { %v1118_v3 = vsub.f32 %v1729_v61, %v1725_v57 }
 0x172   :  { %1730 = vrcp.f32 %v1071_v1  ;;  %v1113_v9 = vand.u32 2147483648, %v1071_v1  ;;  %v1111_v54 = vand.u32 2147483647, %v1071_v1  ;;  %vm1107_vm12 = vweird.f32 %v1071_v1 }
 0x173   :  { %v1121_v32 = vmul.f32 %v1118_v3, %v1100_v2  ;;  %1732 = vtanh.f32 %v973_v4 }
 0x174   :  { %1734 = vtanh.f32 %v1997_v63  ;;  %v1114_v14 = vor.u32 1.1754944e-38, %v1113_v9  ;;  %vm1112_vm14 = vcmp.eq.f32.partialorder %v1111_v54, 8.507059e+37 }
 0x175   :  { %v1124_v5 = vadd.f32 %v1725_v57, %v1121_v32 }
 0x177   :  { %1127 = vst [vmem:[#allocation11 + $0x8] sm:$0xff] %v1124_v5 }
 0x178   :  { %v1731_v6 = vpop.eup %1730 }
 0x179   :  { %v1103_v7 = vmul.f32 %v1731_v6, %v1071_v1  ;;  %vm1108_vm11 = vweird.f32 %v1731_v6  ;;  %v1733_v11 = vpop.eup %1732 }
 0x17a   :  { %v1735_v13 = vpop.eup %1734  ;;  %vm1109_vm13 = vmor %vm1107_vm12, %vm1108_vm11 }
 0x17b   :  { %v1104_v8 = vsub.f32 1.0, %v1103_v7  ;;  %v1119_v15 = vsub.f32 %v1735_v13, %v1733_v11 }
 0x17d   :  { %v1105_v10 = vmul.f32 %v1731_v6, %v1104_v8 }
 0x17f   :  { %v1106_v12 = vadd.f32 %v1731_v6, %v1105_v10 }
 0x181   :  { %v1110_v52 = vsel %vm1109_vm13, %v1731_v6, %v1106_v12 }
 0x182   :  { %v1115_v16 = vsel %vm1112_vm14, %v1114_v14, %v1110_v52 }
 0x183   :  { %v1122_v63 = vmul.f32 %v1119_v15, %v1115_v16 }
 0x185   :  { %v1125_v17 = vadd.f32 %v1733_v11, %v1122_v63 }
 0x187   :  { %1128 = vst [vmem:[#allocation11 + $0x10] sm:$0xff] %v1125_v17 }
 0x188   :  { %1139 = dma.vmem_to_hbm [thread:$0]  %s1135_s19, 384, %s1137_s22, [#allocation4]  }
 0x189   :  { %1886 = dma.done.wait [#allocation4], 384  }
 0x18a   :  { %1887 = vsyncadd [#allocation4], 4294966912 }
 0x18b   :  { %1144 = vsyncpa [#allocation3], 1 }
 0x18c   :  { %1145 = vsyncpa [#allocation6], 1 }
 0x18d   :  { %1146 = vsyncpa [#allocation9], 1 }
 0x18e   :  { %1147 = vsyncpa [#allocation4], 1 }

</bundles_post_ra>
